<compile_context>
chip_gen: v7x
topology: tpu7x:2x2x1
jax: 0.10.0
libtpu: 0.0.40
codegen_flags: <defaults>
</compile_context>

<pallas_src>
import functools

import jax
import jax.numpy as jnp
from jax import lax
from jax.experimental import pallas as pl
from jax.experimental.pallas import tpu as pltpu  # noqa: F401  (TPU backend)


def mlp_head_kernel(*refs, apply_dropout, dropout_rate, hw, t, n, c_in, f_out):
    if apply_dropout:
        x_ref, w1_ref, w2_ref, pk_ref, u_ref, o_ref = refs
    else:
        x_ref, w1_ref, w2_ref, pk_ref, o_ref = refs
        u_ref = None

    inv_hw = 1.0 / float(hw)
    # Guard dropout_rate -> 1.0 (keep-prob 0); the where() selects 0 anyway.
    inv_keep = 1.0 / max(1.0 - float(dropout_rate), 1e-6)

    # --- gap + flatten: AdaptiveAvgPool2d(1) over H*W -> (N, C), ONCE ---
    y0 = jnp.sum(x_ref[...], axis=-1) * inv_hw                    # (N, C)

    if apply_dropout:
        # Broadcast the shared GAP result to all T samples along the matmul
        # M dimension, then apply per-sample dropout mask #1.
        y = jnp.broadcast_to(y0[None], (t, n, c_in)).reshape(t * n, c_in)
        keep1 = u_ref[0] >= dropout_rate                          # (T*N, C)
        y = jnp.where(keep1, y * inv_keep, 0.0)
    else:
        y = y0                                                    # T == 1

    # --- linear1: Linear(C, C, bias=False); contract on the in-channel axis
    #     of the (out, in) PyTorch weight — no transpose op anywhere. ---
    y = lax.dot_general(y, w1_ref[...], (((1,), (1,)), ((), ())),
                        preferred_element_type=jnp.float32)       # (T*N, C)

    # --- bnorm1: BatchNorm1d(C), training-mode biased batch statistics,
    #     computed PER MC sample over its N rows. ---
    yr = y.reshape(t, n, c_in)
    mean = jnp.mean(yr, axis=1, keepdims=True)                    # (T, 1, C)
    var = jnp.mean(jnp.square(yr - mean), axis=1, keepdims=True)  # (T, 1, C)
    gamma = pk_ref[0:1, :c_in][None]                              # (1, 1, C)
    beta = pk_ref[1:2, :c_in][None]                               # (1, 1, C)
    scale = gamma * lax.rsqrt(var + 1e-5)
    shift = beta - mean * scale
    yr = yr * scale + shift

    # --- relu1 ---
    yr = jnp.maximum(yr, 0.0)

    y = yr.reshape(t * n, c_in)
    if apply_dropout:  # F.dropout(p, training=True) before linear2
        keep2 = u_ref[1] >= dropout_rate                          # (T*N, C)
        y = jnp.where(keep2, y * inv_keep, 0.0)

    # --- linear2: Linear(C, num_features, bias=True) ---
    out = lax.dot_general(y, w2_ref[...], (((1,), (1,)), ((), ())),
                          preferred_element_type=jnp.float32)     # (T*N, F)
    out = out + pk_ref[2:3, :f_out]
    o_ref[...] = out.astype(o_ref.dtype)


def pack_head_params(gamma, beta, b2):
    """Pack (bnorm1.weight, bnorm1.bias, linear2.bias) into one (3, max(C,F))
    array.  Call once at parameter-init time (outside the hot forward path)."""
    c = gamma.shape[0]
    f = b2.shape[0]
    p = max(c, f)
    packed = jnp.zeros((3, p), jnp.float32)
    packed = packed.at[0, :c].set(gamma.astype(jnp.float32))
    packed = packed.at[1, :c].set(beta.astype(jnp.float32))
    packed = packed.at[2, :f].set(b2.astype(jnp.float32))
    return packed


@functools.partial(jax.jit,
                   static_argnames=("dropout", "num_samples", "dropout_rate"))
def mlp_head_forward(x, w1, w2, packed_params, key, *, dropout=False,
                     num_samples=1, dropout_rate=0.2):
    """Forward pass of MLPHeadWithMCDropout.

    x:             (N, C, H, W) float32
    w1:            linear1.weight, (C, C)            (bias=False)
    w2:            linear2.weight, (num_features, C)
    packed_params: pack_head_params(gamma, beta, b2) -> (3, max(C, F))
    key:           jax PRNG key (only used when dropout=True)
    Returns (N, F) when dropout=False, else (num_samples, N, F) MC samples.
    """
    N, C, H, W = x.shape
    F_out = w2.shape[0]
    HW = H * W
    T = int(num_samples) if dropout else 1

    x_flat = x.reshape(N, C, HW)                      # free metadata reshape

    kernel = functools.partial(
        mlp_head_kernel,
        apply_dropout=bool(dropout),
        dropout_rate=float(dropout_rate),
        hw=HW, t=T, n=N, c_in=C, f_out=F_out)

    args = (x_flat, w1, w2, packed_params)
    if dropout:
        # Two full-width uniform draws cover BOTH dropout sites for ALL T
        # samples (generated once in the jitted wrapper, tiny VMEM block).
        u = jax.random.uniform(key, (2, T * N, C), dtype=jnp.float32)
        args = args + (u,)

    # Single grid step; every operand is a whole-array VMEM block (total
    # footprint ~20 KB), output written once as a lane-contiguous 2-D block.
    out = pl.pallas_call(
        kernel,
        out_shape=jax.ShapeDtypeStruct((T * N, F_out), jnp.float32),
    )(*args)

    return out.reshape(T, N, F_out) if dropout else out


if __name__ == "__main__":
    # Small shapes consistent with the module: batch=2, in_channels=4,
    # spatial 16x16, num_features=32.
    N, C, H, W = 2, 4, 16, 16
    NUM_FEATURES = 32
    DROPOUT_RATE = 0.2

    key = jax.random.PRNGKey(0)
    kx, k1, kg, kb, k2, kb2, kd0, kd1 = jax.random.split(key, 8)

    x = jax.random.normal(kx, (N, C, H, W), dtype=jnp.float32)

    # Deterministic parameter init (shapes follow nn.Linear / nn.BatchNorm1d).
    bound = 1.0 / float(C) ** 0.5
    w1 = jax.random.uniform(k1, (C, C), jnp.float32, -bound, bound)            # linear1.weight (out, in)
    gamma = 1.0 + 0.1 * jax.random.normal(kg, (C,), jnp.float32)               # bnorm1.weight
    beta = 0.1 * jax.random.normal(kb, (C,), jnp.float32)                      # bnorm1.bias
    w2 = jax.random.uniform(k2, (NUM_FEATURES, C), jnp.float32, -bound, bound)  # linear2.weight
    b2 = jax.random.uniform(kb2, (NUM_FEATURES,), jnp.float32, -bound, bound)   # linear2.bias

    packed = pack_head_params(gamma, beta, b2)   # done once at init time

    # ---- deterministic path (dropout=False), matches PyTorch default ----
    out = mlp_head_forward(x, w1, w2, packed, kd0)
    out = jax.block_until_ready(out)
    assert out.shape == (N, NUM_FEATURES) and out.dtype == jnp.float32

    # Pure-JAX reference of the same forward path (train-mode BN stats).
    y_ref = jnp.mean(x.reshape(N, C, H * W), axis=-1)
    y_ref = y_ref @ w1.T
    m = jnp.mean(y_ref, axis=0, keepdims=True)
    v = jnp.mean((y_ref - m) ** 2, axis=0, keepdims=True)
    y_ref = (y_ref - m) / jnp.sqrt(v + 1e-5) * gamma[None, :] + beta[None, :]
    y_ref = jnp.maximum(y_ref, 0.0)
    y_ref = y_ref @ w2.T + b2[None, :]
    assert jnp.allclose(out, y_ref, atol=1e-4, rtol=1e-4)

    # ---- MC-dropout path with rate=0 must reproduce the deterministic output ----
    mc_zero = mlp_head_forward(x, w1, w2, packed, kd0, dropout=True,
                               num_samples=4, dropout_rate=0.0)
    mc_zero = jax.block_until_ready(mc_zero)
    assert mc_zero.shape == (4, N, NUM_FEATURES)
    assert jnp.allclose(mc_zero, y_ref[None], atol=1e-4, rtol=1e-4)

    # ---- MC-dropout path: T stochastic samples in ONE kernel invocation ----
    T = 8
    mc = mlp_head_forward(x, w1, w2, packed, kd1, dropout=True, num_samples=T,
                          dropout_rate=DROPOUT_RATE)
    mc = jax.block_until_ready(mc)
    assert mc.shape == (T, N, NUM_FEATURES) and mc.dtype == jnp.float32
    assert bool(jnp.all(jnp.isfinite(mc)))
    # Samples must actually differ (independent dropout masks per sample).
    assert float(jnp.max(jnp.std(mc, axis=0))) > 0.0

    print("KERNEL_OK")
</pallas_src>

<mosaic_0001>
module attributes {stable_mosaic.version = 11 : i64} {
  func.func @mlp_head_kernel(%arg0: memref<2x4x256xf32, #tpu.memory_space<vmem>>, %arg1: memref<4x4xf32, #tpu.memory_space<vmem>>, %arg2: memref<32x4xf32, #tpu.memory_space<vmem>>, %arg3: memref<3x32xf32, #tpu.memory_space<vmem>>, %arg4: memref<2x32xf32, #tpu.memory_space<vmem>>) attributes {dimension_semantics = [], scalar_prefetch = 0 : i64, scratch_operands = 0 : i64, tpu.core_type = #tpu.core_type<tc>} {
    %c0 = arith.constant 0 : index
    %c0_0 = arith.constant 0 : index
    %c0_1 = arith.constant 0 : index
    %0 = vector.load %arg0[%c0, %c0_0, %c0_1] : memref<2x4x256xf32, #tpu.memory_space<vmem>>, vector<2x4x256xf32>
    %cst = arith.constant dense<0.000000e+00> : vector<2x4xf32>
    %1 = vector.multi_reduction <add>, %0, %cst [2] : vector<2x4x256xf32> to vector<2x4xf32>
    %cst_2 = arith.constant 3.906250e-03 : f32
    %2 = vector.broadcast %cst_2 : f32 to vector<2x4xf32>
    %3 = arith.mulf %1, %2 : vector<2x4xf32>
    %c0_3 = arith.constant 0 : index
    %c0_4 = arith.constant 0 : index
    %4 = vector.load %arg1[%c0_3, %c0_4] : memref<4x4xf32, #tpu.memory_space<vmem>>, vector<4x4xf32>
    %cst_5 = arith.constant dense<0.000000e+00> : vector<2x4xf32>
    %5 = tpu.matmul %3, %4, %cst_5 {dimension_numbers = #tpu.dot_dimension_numbers<[1], [1], [0], [0], [0, 0, 1, 0], [], []>} : vector<2x4xf32>, vector<4x4xf32>, vector<2x4xf32> -> vector<2x4xf32>
    %6 = vector.shape_cast %5 : vector<2x4xf32> to vector<1x2x4xf32>
    %cst_6 = arith.constant dense<0.000000e+00> : vector<1x4xf32>
    %7 = vector.multi_reduction <add>, %6, %cst_6 [1] : vector<1x2x4xf32> to vector<1x4xf32>
    %8 = vector.shape_cast %7 : vector<1x4xf32> to vector<1x1x4xf32>
    %cst_7 = arith.constant 2.000000e+00 : f32
    %9 = vector.broadcast %cst_7 : f32 to vector<1x1x4xf32>
    %10 = arith.divf %8, %9 : vector<1x1x4xf32>
    %11 = vector.broadcast %10 : vector<1x1x4xf32> to vector<1x2x4xf32>
    %12 = arith.subf %6, %11 : vector<1x2x4xf32>
    %13 = arith.mulf %12, %12 : vector<1x2x4xf32>
    %cst_8 = arith.constant dense<0.000000e+00> : vector<1x4xf32>
    %14 = vector.multi_reduction <add>, %13, %cst_8 [1] : vector<1x2x4xf32> to vector<1x4xf32>
    %15 = vector.shape_cast %14 : vector<1x4xf32> to vector<1x1x4xf32>
    %cst_9 = arith.constant 2.000000e+00 : f32
    %16 = vector.broadcast %cst_9 : f32 to vector<1x1x4xf32>
    %17 = arith.divf %15, %16 : vector<1x1x4xf32>
    %c0_10 = arith.constant 0 : index
    %c0_11 = arith.constant 0 : index
    %18 = vector.load %arg3[%c0_10, %c0_11] : memref<3x32xf32, #tpu.memory_space<vmem>>, vector<1x4xf32>
    %19 = vector.shape_cast %18 : vector<1x4xf32> to vector<1x1x4xf32>
    %c1 = arith.constant 1 : index
    %c0_12 = arith.constant 0 : index
    %20 = vector.load %arg3[%c1, %c0_12] : memref<3x32xf32, #tpu.memory_space<vmem>>, vector<1x4xf32>
    %21 = vector.shape_cast %20 : vector<1x4xf32> to vector<1x1x4xf32>
    %cst_13 = arith.constant 9.99999974E-6 : f32
    %22 = vector.broadcast %cst_13 : f32 to vector<1x1x4xf32>
    %23 = arith.addf %17, %22 : vector<1x1x4xf32>
    %24 = math.rsqrt %23 : vector<1x1x4xf32>
    %25 = arith.mulf %19, %24 : vector<1x1x4xf32>
    %26 = arith.mulf %10, %25 : vector<1x1x4xf32>
    %27 = arith.subf %21, %26 : vector<1x1x4xf32>
    %28 = vector.broadcast %25 : vector<1x1x4xf32> to vector<1x2x4xf32>
    %29 = arith.mulf %6, %28 : vector<1x2x4xf32>
    %30 = vector.broadcast %27 : vector<1x1x4xf32> to vector<1x2x4xf32>
    %31 = arith.addf %29, %30 : vector<1x2x4xf32>
    %cst_14 = arith.constant 0.000000e+00 : f32
    %32 = vector.broadcast %cst_14 : f32 to vector<1x2x4xf32>
    %33 = arith.maximumf %31, %32 : vector<1x2x4xf32>
    %34 = vector.shape_cast %33 : vector<1x2x4xf32> to vector<2x4xf32>
    %c0_15 = arith.constant 0 : index
    %c0_16 = arith.constant 0 : index
    %35 = vector.load %arg2[%c0_15, %c0_16] : memref<32x4xf32, #tpu.memory_space<vmem>>, vector<32x4xf32>
    %cst_17 = arith.constant dense<0.000000e+00> : vector<2x32xf32>
    %36 = tpu.matmul %34, %35, %cst_17 {dimension_numbers = #tpu.dot_dimension_numbers<[1], [1], [0], [0], [0, 0, 1, 0], [], []>} : vector<2x4xf32>, vector<32x4xf32>, vector<2x32xf32> -> vector<2x32xf32>
    %c2 = arith.constant 2 : index
    %c0_18 = arith.constant 0 : index
    %37 = vector.load %arg3[%c2, %c0_18] : memref<3x32xf32, #tpu.memory_space<vmem>>, vector<1x32xf32>
    %38 = vector.broadcast %37 : vector<1x32xf32> to vector<2x32xf32>
    %39 = arith.addf %36, %38 : vector<2x32xf32>
    %c0_19 = arith.constant 0 : index
    %c0_20 = arith.constant 0 : index
    %40 = vector.load %arg4[%c0_19, %c0_20] : memref<2x32xf32, #tpu.memory_space<vmem>>, vector<2x32xf32>
    tpu.vector_store %arg4[%c0_19, %c0_20], %39 {strides = array<i32>} : memref<2x32xf32, #tpu.memory_space<vmem>>, vector<2x32xf32>,
    return
  }
}

</mosaic_0001>

<bundles_post_ra>
// kernel: mlp_head_forward.1
= control target key start
LH: loop header
LB: loop body
LE: loop exit
PB: predicated region body
PF: predicated region fallthrough
CT: control target
= control target key end

     0   :  { %vm26_vm0 = vcmask 1043456   ;;  %s425_s0 = inlined_call_operand.vmem [shape: f32[2,4,256], index: 0, kind: input, shape index: {}]   ;;  %s426_s1 = inlined_call_operand.vmem [shape: f32[4,4], index: 1, kind: input, shape index: {}]   ;;  %s427_s2 = inlined_call_operand.vmem [shape: f32[32,4], index: 2, kind: input, shape index: {}]   ;;  %s428_s3 = inlined_call_operand.vmem [shape: f32[3,32], index: 3, kind: input, shape index: {}]   ;;  %s429_s4 = inlined_call_operand.hbm [shape: f32[2,32], index: 4, kind: output, shape index: {}]  }
   0x1   :  { %v18_v0 = vld [vmem:[%s425_s0] sm:$0xff]  ;;  %v19_v1 = vld [vmem:[%s425_s0 + $0x8] sm:$0xff] }
   0x2   :  { %9 = vsyncpa [#allocation3], 0  ;;  %v22_v2 = vcombine.high %v18_v0, %v18_v0  ;;  %v27_v3 = vsel %vm26_vm0, %v18_v0, 0.0  ;;  %v23_v4 = vcombine.high %v19_v1, %v19_v1  ;;  %v32_v6 = vsel %vm26_vm0, %v19_v1, 0.0  ;;  %v39_v11 = vld [vmem:[%s426_s1] sm:$0xf] }
   0x3   :  { %v349_v10 = vmov 0.0   ;;  %vm54_vm1 = vcmask 31744   ;;  %vm350_vm2 = vmmov 0   ;;  %v42_v12 = vlaneseq  ;;  %v168_v23 = vld [vmem:[%s427_s2] sm:$0xff]  ;;  %v169_v24 = vld [vmem:[%s427_s2 + $0x8] sm:$0xff]  ;;  %v170_v27 = vld [vmem:[%s427_s2 + $0x10] sm:$0xff] }
   0x4   :  { %v28_v5 = vsel %vm26_vm0, %v22_v2, 0.0  ;;  %v33_v7 = vsel %vm26_vm0, %v23_v4, 0.0  ;;  %293 = vmatprep.subr.mxu0 %v349_v10  ;;  %295 = vmatprep.mubr.msk.f32.mxu0 %vm350_vm2, %v349_v10  ;;  %vm52_vm3 = vcmask 1041409   ;;  %v310_v25 = vpack.c.bf16 %v169_v24, %v168_v23  ;;  %vm311_vm4 = vmpackc.low %vm54_vm1, %vm54_vm1  ;;  %v171_v28 = vld [vmem:[%s427_s2 + $0x18] sm:$0xff]  ;;  %v150_v51 = vld [vmem:[%s428_s3] sm:$0x1] }
   0x5   :  { %v29_v8 = vadd.f32 %v28_v5, %v27_v3  ;;  %v34_v9 = vadd.f32 %v33_v7, %v32_v6  ;;  %294 = vmatpush3.xpose.msk.msra.mxu0 %vm54_vm1, %v39_v11  ;;  %306 = vmatprep.mubr.msk.f32.mxu1 %vm350_vm2, %v349_v10  ;;  %v43_v13 = vand.u32 127, %v42_v12  ;;  %v45_v14 = vshrl.u32 %v42_v12, 7  ;;  %v151_v55 = vld [vmem:[%s428_s3 + $0x1] sm:$0x1]  ;;  %v280_v63 = vld [vmem:[%s428_s3 + $0x2] ss:$0 sm:$0xff] }
   0x6   :  { %v351_v26 = vmov 0.0|0.0   ;;  %v314_v29 = vpack.c.bf16 %v171_v28, %v170_v27  ;;  %vm130_vm5 = vcmask 25600   ;;  %s352_s6 = smov [#allocation2]   ;;  %vm262_vm6 = vcmask 254976  }
   0x7   :  { %30 = vadd.xlane.f32.xlu0 %v29_v8  ;;  %v46_v16 = vsub.s32 %v43_v13, %v45_v14  ;;  %309 = vmatprep.subr.bf16.mxu1 %v351_v26  ;;  %v159_v52 = vsub.s32 0, %v45_v14  ;;  %s270_s7 = sshll.u32 %s352_s6, 4  ;;  %s271_s7 = int_to_ptr.vmem [resolvable:$true] %s270_s7 }
   0x8   :  { %312 = vmatpush3.bf16.xpose.msk.msra.mxu1 %vm311_vm4, %v310_v25  ;;  %s325_s8 = scalar_lea.vmem %s271_s7, 32  ;;  %p330_p1 = scmp.lt.s32.totalorder %s271_s7, %s271_s7 }
   0x9   :  { %313 = vmatprep.subr.bf16.mxu1 %v351_v26  ;;  %p326_p0 = scmp.ne.s32.totalorder %s271_s7, %s325_s8  ;;  %p331_p2 = scmp.lt.s32.totalorder %s325_s8, %s325_s8 }
   0xb   :  { %35 = vadd.xlane.f32.xlu0 %v34_v9  ;;  %p332_p3 = por %p331_p2, %p330_p1 }
   0xd   :  { %p333_p4 = pnand %p332_p3, %p326_p0 }
  0x10   :  { %316 = vmatpush3.bf16.xpose.msk.msra.mxu1 %vm311_vm4, %v314_v29 }
  0x94   :  { %v31_v15 = vpop.xlane.xlu0 %30 }
  0x95   :  { %v37_v17 = vmul.f32 0.00390625, %v31_v15 }
  0x97   :  { %v47_v20 = vrot.slane %v37_v17, %v46_v16 }
  0x98   :  { %v36_v18 = vpop.xlane.xlu0 %35 }
  0x99   :  { %v38_v19 = vmul.f32 0.00390625, %v36_v18 }
  0x9b   :  { %v51_v21 = vrot.slane %v38_v19, %v46_v16 }
  0x9d   :  { %v53_v22 = vsel %vm52_vm3, %v51_v21, %v47_v20 }
  0x9e   :  { %296 = vmatmul.mubr.msk.f32.vlgmr.msra.gmra.mrb[0].mxu0 %vm54_vm1, %v53_v22 }
 0x171   :  { %v126_v30 = vpop.f32.mrb[0].mxu0 }
 0x172   :  { %v131_v31 = vsel %vm130_vm5, %v126_v30, 0.0  ;;  %v297_v32 = vpop.f32.mrb[1].mxu0 }
 0x173   :  { %v132_v33 = vrot.slane %v131_v31, 4 }
 0x175   :  { %v133_v34 = vadd.f32 %v132_v33, %v131_v31 }
 0x177   :  { %v134_v35 = vrot.slane %v133_v34, 2 }
 0x179   :  { %v135_v36 = vadd.f32 %v134_v35, %v133_v34 }
 0x17b   :  { %v136_v37 = vrot.slane %v135_v36, 1 }
 0x17d   :  { %v137_v38 = vadd.f32 %v136_v37, %v135_v36 }
 0x17f   :  { %v139_v39 = vmul.f32 0.5, %v137_v38 }
 0x181   :  { %v140_v40 = vsub.f32 %v126_v30, %v139_v39 }
 0x183   :  { %v141_v41 = vmul.f32 %v140_v40, %v140_v40 }
 0x185   :  { %v142_v42 = vsel %vm130_vm5, %v141_v41, 0.0 }
 0x186   :  { %v143_v43 = vrot.slane %v142_v42, 4 }
 0x188   :  { %v144_v44 = vadd.f32 %v143_v43, %v142_v42 }
 0x18a   :  { %v145_v45 = vrot.slane %v144_v44, 2 }
 0x18c   :  { %v146_v46 = vadd.f32 %v145_v45, %v144_v44 }
 0x18e   :  { %v147_v47 = vrot.slane %v146_v46, 1 }
 0x190   :  { %v148_v48 = vadd.f32 %v147_v47, %v146_v46 }
 0x192   :  { %v149_v49 = vmul.f32 0.5, %v148_v48 }
 0x194   :  { %v152_v50 = vadd.f32 1e-05, %v149_v49 }
 0x196   :  { %323 = vrsqrt.f32 %v152_v50 }
 0x1a0   :  { %v324_v53 = vpop.eup %323 }
 0x1a1   :  { %v154_v54 = vmul.f32 %v324_v53, %v150_v51 }
 0x1a3   :  { %v155_v56 = vmul.f32 %v154_v54, %v139_v39  ;;  %v160_v57 = vrot.slane %v154_v54, %v159_v52 }
 0x1a5   :  { %v156_v58 = vsub.f32 %v151_v55, %v155_v56  ;;  %v161_v59 = vmul.f32 %v160_v57, %v126_v30 }
 0x1a7   :  { %v165_v60 = vrot.slane %v156_v58, %v159_v52 }
 0x1a9   :  { %v166_v61 = vadd.f32 %v165_v60, %v161_v59 }
 0x1ab   :  { %v167_v62 = vmax.f32 %v166_v61, 0.0 }
 0x1ad   :  { %307 = vmatmul.mubr.msk.f32.vlgmr.msra.gmra.mrb[0].mxu1 %vm54_vm1, %v167_v62 }
 0x280   :  { %v258_v0 = vpop.f32.mrb[0].mxu1 }
 0x281   :  { %v259_v1 = vadd.f32 %v280_v63, %v258_v0  ;;  %v308_v2 = vpop.f32.mrb[1].mxu1 }
 0x283   :  { %263 = vst.msk [vmem:[#allocation2] sm:$0x3] %vm262_vm6, %v259_v1 }
 0x284   :  { %336 = shalt.err (!%p333_p4)
}
 0x285   :  { %s337_s11 = scalar_lea.hbm %s429_s4, 32 }
 0x286   :  { %p338_p5 = scmp.ne.s32.totalorder %s429_s4, %s337_s11  ;;  %p341_p6 = scmp.lt.u32.totalorder %s337_s11, %s429_s4 }
 0x288   :  { %p343_p7 = pnand %p341_p6, %p338_p5 }
 0x28a   :  { %346 = shalt.err (!%p343_p7)
}
 0x28b   :  { %273 = dma.vmem_to_hbm [thread:$0]  %s271_s7, 32, %s429_s4, [#allocation3]  }
 0x28c   :  { %347 = dma.done.wait [#allocation3], 32  }
 0x28d   :  { %348 = vsyncadd [#allocation3], 4294967264 }
 0x28e   :  { %277 = vsyncpa [#allocation3], 1 }

</bundles_post_ra>
